<compile_context>
chip_gen: v7x
topology: tpu7x:2x2x1
jax: 0.10.0
libtpu: 0.0.40
codegen_flags: <defaults>
</compile_context>

<pallas_src>
import functools

import jax
import jax.numpy as jnp
from jax import lax
from jax.experimental import pallas as pl
from jax.experimental.pallas import tpu as pltpu


def _round_up(n, m):
    return ((n + m - 1) // m) * m


def _pick_tile(n, target, multiple):
    """Return (tile, padded_extent) for an axis of length n.

    * n <= target           -> one full-extent block, no padding.
    * aligned exact divisor -> largest multiple of `multiple` <= target
                               that divides n.
    * otherwise             -> pad n and take the aligned tile <= target
                               with the least padding (ties -> larger tile).
    """
    if n <= target:
        return n, n
    t0 = max((target // multiple) * multiple, multiple)
    for t in range(t0, multiple - 1, -multiple):
        if n % t == 0:
            return t, n
    best_t = multiple
    best_pad = _round_up(n, multiple) - n
    for t in range(t0, multiple - 1, -multiple):
        pad = _round_up(n, t) - n
        if pad < best_pad:
            best_t, best_pad = t, pad
    return best_t, n + best_pad


def _flash_dot_kernel(q_ref, k_ref, v_ref, o_ref,
                      m_ref, l_ref, acc_ref, qs_ref,
                      *, scale, mxu_dtype, dv, nk_valid, tk, mask_keys,
                      fused_sum):
    """One (batch, q-tile, k-tile) grid step of flash-style dot attention.

    q_ref: (TQ, Dk)  k_ref: (TK, Dk)  v_ref: (TK, Dv_pad)  o_ref: (TQ, Dv_pad)
    scratch: m (TQ,1) f32, l (TQ,1) f32, acc (TQ,Dv_pad) f32, qs (TQ,Dk) mxu.
    """
    ki = pl.program_id(2)

    @pl.when(ki == 0)
    def _init():
        m_ref[...] = jnp.full_like(m_ref, -jnp.inf)
        l_ref[...] = jnp.zeros_like(l_ref)
        acc_ref[...] = jnp.zeros_like(acc_ref)
        # Hoisted once per q-tile (resident across the key axis): fold the
        # 1/sqrt(Dk) scale into q and cast to the MXU operand dtype.
        qs_ref[...] = (q_ref[...].astype(jnp.float32)
                       * jnp.asarray(scale, jnp.float32)).astype(mxu_dtype)

    qs = qs_ref[...]
    kt = k_ref[...].astype(mxu_dtype)

    # scores[i, j] = <q_i, k_j> * scale -> (TQ, TK); contract last dims of
    # both operands so no transpose / XLU copy of the K tile is needed.
    s = lax.dot_general(
        qs, kt,
        dimension_numbers=(((1,), (1,)), ((), ())),
        preferred_element_type=jnp.float32,
    )

    if mask_keys:
        col = lax.broadcasted_iota(jnp.int32, s.shape, 1) + ki * tk
        s = jnp.where(col < nk_valid, s, -jnp.inf)

    # Online softmax update over the key axis (all statistics in f32).
    m_prev = m_ref[...]
    m_new = jnp.maximum(m_prev, jnp.max(s, axis=-1, keepdims=True))
    alpha = jnp.exp(m_prev - m_new)
    p = jnp.exp(s - m_new)

    if not fused_sum:
        # Dv already lane-dense: keep the explicit row-sum.
        l_ref[...] = alpha * l_ref[...] + jnp.sum(p, axis=-1, keepdims=True)

    acc_ref[...] = alpha * acc_ref[...] + jnp.dot(
        p.astype(mxu_dtype), v_ref[...].astype(mxu_dtype),
        preferred_element_type=jnp.float32)
    m_ref[...] = m_new

    @pl.when(ki == pl.num_programs(2) - 1)
    def _finalize():
        acc = acc_ref[...]
        if fused_sum:
            # The ones column of the padded V carries the softmax row-sum.
            l = acc[:, dv:dv + 1]
        else:
            l = l_ref[...]
        inv = pl.reciprocal(l, approx=True)      # EUP vrcp (otherwise idle)
        inv = inv * (2.0 - l * inv)              # one NR step -> ~f32 exact
        o_ref[...] = (acc * inv).astype(o_ref.dtype)


def dot_attention(k, q, v, *, tq_target=512, tk_target=512,
                  mxu_dtype=jnp.bfloat16):
    """Pallas flash-style 'dot' attention.

    k: (B, Nk, Dk), q: (B, Nq, Dk), v: (B, Nk, Dv)  ->  (B, Nq, Dv)

    mxu_dtype is the matmul-operand dtype (bf16 default: native MXU rate;
    softmax / accumulation stay f32).  Use jnp.float32 for reference-exact
    results at reduced MXU throughput.
    """
    B, Nk, Dk = k.shape
    Bq, Nq, Dkq = q.shape
    Bv, Nkv, Dv = v.shape
    assert B == Bq == Bv and Dk == Dkq and Nk == Nkv
    out_dtype = q.dtype
    scale = 1.0 / float(Dk) ** 0.5

    # ---- tiling -----------------------------------------------------------
    tk, nk_pad = _pick_tile(Nk, tk_target, 128)   # lane dim of score tile
    tq, nq_pad = _pick_tile(Nq, tq_target, 8)     # sublane dim
    # v7x megacore: keep >= 2 parallel grid blocks when possible.
    if B * (nq_pad // tq) < 2 and tq % 16 == 0:
        tq //= 2
    mask_keys = nk_pad != Nk

    # ---- lane-dense V / output + fused row-sum column ----------------------
    fused_sum = (Dv % 128) != 0
    if fused_sum:
        dv_pad = _round_up(Dv + 1, 128)
        v_ext = jnp.zeros((B, nk_pad, dv_pad), mxu_dtype)
        v_ext = v_ext.at[:, :Nk, :Dv].set(v.astype(mxu_dtype))
        v_ext = v_ext.at[:, :Nk, Dv].set(jnp.asarray(1.0, mxu_dtype))
    else:
        dv_pad = Dv
        v_ext = v if nk_pad == Nk else jnp.pad(
            v, ((0, 0), (0, nk_pad - Nk), (0, 0)))

    if nk_pad != Nk:
        k = jnp.pad(k, ((0, 0), (0, nk_pad - Nk), (0, 0)))
    if nq_pad != Nq:
        q = jnp.pad(q, ((0, 0), (0, nq_pad - Nq), (0, 0)))

    grid = (B, nq_pad // tq, nk_pad // tk)

    kernel = functools.partial(
        _flash_dot_kernel, scale=scale, mxu_dtype=mxu_dtype, dv=Dv,
        nk_valid=Nk, tk=tk, mask_keys=mask_keys, fused_sum=fused_sum)

    cost = pl.CostEstimate(
        flops=2 * B * nq_pad * nk_pad * (Dk + dv_pad),
        transcendentals=B * nq_pad * nk_pad,
        bytes_accessed=(q.size * q.dtype.itemsize
                        + (nq_pad // tq) * (k.size * k.dtype.itemsize
                                            + v_ext.size * v_ext.dtype.itemsize)
                        + B * nq_pad * dv_pad * jnp.dtype(out_dtype).itemsize),
    )

    out = pl.pallas_call(
        kernel,
        out_shape=jax.ShapeDtypeStruct((B, nq_pad, dv_pad), out_dtype),
        grid_spec=pltpu.PrefetchScalarGridSpec(
            num_scalar_prefetch=0,
            grid=grid,
            in_specs=[
                pl.BlockSpec((pl.Squeezed(), tq, Dk),
                             lambda b, qi, ki: (b, qi, 0)),
                pl.BlockSpec((pl.Squeezed(), tk, Dk),
                             lambda b, qi, ki: (b, ki, 0)),
                pl.BlockSpec((pl.Squeezed(), tk, dv_pad),
                             lambda b, qi, ki: (b, ki, 0)),
            ],
            out_specs=pl.BlockSpec((pl.Squeezed(), tq, dv_pad),
                                   lambda b, qi, ki: (b, qi, 0)),
            scratch_shapes=[
                pltpu.VMEM((tq, 1), jnp.float32),        # running max  m
                pltpu.VMEM((tq, 1), jnp.float32),        # running sum  l
                pltpu.VMEM((tq, dv_pad), jnp.float32),   # accumulator  acc
                pltpu.VMEM((tq, Dk), mxu_dtype),         # hoisted scaled q
            ],
        ),
        compiler_params=pltpu.CompilerParams(
            dimension_semantics=("parallel", "parallel", "arbitrary"),
            vmem_limit_bytes=32 * 1024 * 1024,   # portable to v7x (64 MiB VMEM)
        ),
        cost_estimate=cost,
    )(q, k, v_ext)

    if nq_pad != Nq or dv_pad != Dv:
        out = out[:, :Nq, :Dv]
    return out


def dot_attention_ref(k, q, v):
    """Pure-JAX reference mirroring the PyTorch _dot_attention."""
    scale = 1.0 / jnp.sqrt(jnp.asarray(k.shape[-1], jnp.float32))
    weights = jnp.einsum('bjk,bik->bij', k, q) * scale
    p = jax.nn.softmax(weights, axis=-1)
    return jnp.einsum('bik,bkj->bij', p, v)


if __name__ == "__main__":
    base = jax.random.PRNGKey(0)
    keys = jax.random.split(base, 9)

    # --- small shapes consistent with the NP attention module --------------
    B, Nk, Nq, D = 2, 8, 8, 32
    k1 = jax.random.normal(keys[0], (B, Nk, D), dtype=jnp.float32)
    q1 = jax.random.normal(keys[1], (B, Nq, D), dtype=jnp.float32)
    v1 = jax.random.normal(keys[2], (B, Nk, D), dtype=jnp.float32)
    ref1 = dot_attention_ref(k1, q1, v1)

    out1_f32 = jax.block_until_ready(
        dot_attention(k1, q1, v1, mxu_dtype=jnp.float32))
    assert out1_f32.shape == (B, Nq, D), out1_f32.shape
    assert jnp.allclose(out1_f32, ref1, atol=2e-5, rtol=2e-5), \
        float(jnp.max(jnp.abs(out1_f32 - ref1)))

    out1_bf = jax.block_until_ready(dot_attention(k1, q1, v1))   # bf16 MXU
    assert jnp.allclose(out1_bf, ref1, atol=5e-2, rtol=5e-2), \
        float(jnp.max(jnp.abs(out1_bf - ref1)))

    # --- larger shapes: multi-tile flash path ------------------------------
    B2, Nk2, Nq2, D2 = 2, 512, 384, 64
    k2 = jax.random.normal(keys[3], (B2, Nk2, D2), dtype=jnp.float32)
    q2 = jax.random.normal(keys[4], (B2, Nq2, D2), dtype=jnp.float32)
    v2 = jax.random.normal(keys[5], (B2, Nk2, D2), dtype=jnp.float32)
    ref2 = dot_attention_ref(k2, q2, v2)

    out2_bf = jax.block_until_ready(dot_attention(k2, q2, v2))   # bf16 MXU
    assert out2_bf.shape == (B2, Nq2, D2), out2_bf.shape
    assert jnp.allclose(out2_bf, ref2, atol=5e-2, rtol=5e-2), \
        float(jnp.max(jnp.abs(out2_bf - ref2)))

    out2_f32 = jax.block_until_ready(
        dot_attention(k2, q2, v2, mxu_dtype=jnp.float32))
    assert jnp.allclose(out2_f32, ref2, atol=2e-5, rtol=2e-5), \
        float(jnp.max(jnp.abs(out2_f32 - ref2)))

    # --- ragged key axis: exercises 128-aligned tiling + in-kernel mask ----
    B3, Nk3, Nq3, D3 = 2, 200, 100, 48
    k3 = jax.random.normal(keys[6], (B3, Nk3, D3), dtype=jnp.float32)
    q3 = jax.random.normal(keys[7], (B3, Nq3, D3), dtype=jnp.float32)
    v3 = jax.random.normal(keys[8], (B3, Nk3, D3), dtype=jnp.float32)
    ref3 = dot_attention_ref(k3, q3, v3)

    out3 = jax.block_until_ready(
        dot_attention(k3, q3, v3, tq_target=128, tk_target=128,
                      mxu_dtype=jnp.float32))
    assert out3.shape == (B3, Nq3, D3), out3.shape
    assert jnp.allclose(out3, ref3, atol=2e-5, rtol=2e-5), \
        float(jnp.max(jnp.abs(out3 - ref3)))

    print("KERNEL_OK")
</pallas_src>

<mosaic_0001>
module attributes {stable_mosaic.version = 11 : i64} {
  func.func @_flash_dot_kernel(%arg0: i32, %arg1: i32, %arg2: i32, %arg3: memref<1x8x32xf32, #tpu.memory_space<vmem>>, %arg4: memref<1x8x32xf32, #tpu.memory_space<vmem>>, %arg5: memref<1x8x128xf32, #tpu.memory_space<vmem>>, %arg6: memref<1x8x128xf32, #tpu.memory_space<vmem>>, %arg7: memref<8x1xf32, #tpu.memory_space<vmem>>, %arg8: memref<8x1xf32, #tpu.memory_space<vmem>>, %arg9: memref<8x128xf32, #tpu.memory_space<vmem>>, %arg10: memref<8x32xf32, #tpu.memory_space<vmem>>) attributes {dimension_semantics = [#tpu.dimension_semantics<parallel>, #tpu.dimension_semantics<parallel>, #tpu.dimension_semantics<arbitrary>], iteration_bounds = array<i64: 2, 1, 1>, scalar_prefetch = 0 : i64, scratch_operands = 4 : i64, tpu.core_type = #tpu.core_type<tc>, window_params = [{transform_indices = @transform_0, window_bounds = array<i64: 1, 8, 32>}, {transform_indices = @transform_1, window_bounds = array<i64: 1, 8, 32>}, {transform_indices = @transform_2, window_bounds = array<i64: 1, 8, 128>}, {transform_indices = @transform_3, window_bounds = array<i64: 1, 8, 128>}]} {
    %c0_i32 = arith.constant 0 : i32
    %0 = arith.cmpi eq, %arg2, %c0_i32 : i32
    %1 = arith.extui %0 : i1 to i32
    %c0_i32_0 = arith.constant 0 : i32
    %2 = arith.cmpi ne, %1, %c0_i32_0 : i32
    scf.if %2 {
      %cst_20 = arith.constant 0xFF800000 : f32
      %28 = vector.broadcast %cst_20 : f32 to vector<8x1xf32>
      %c0_21 = arith.constant 0 : index
      %c0_22 = arith.constant 0 : index
      %29 = vector.load %arg7[%c0_21, %c0_22] : memref<8x1xf32, #tpu.memory_space<vmem>>, vector<8x1xf32>
      tpu.vector_store %arg7[%c0_21, %c0_22], %28 {strides = array<i32>} : memref<8x1xf32, #tpu.memory_space<vmem>>, vector<8x1xf32>,
      %cst_23 = arith.constant 0.000000e+00 : f32
      %30 = vector.broadcast %cst_23 : f32 to vector<8x1xf32>
      %c0_24 = arith.constant 0 : index
      %c0_25 = arith.constant 0 : index
      %31 = vector.load %arg8[%c0_24, %c0_25] : memref<8x1xf32, #tpu.memory_space<vmem>>, vector<8x1xf32>
      tpu.vector_store %arg8[%c0_24, %c0_25], %30 {strides = array<i32>} : memref<8x1xf32, #tpu.memory_space<vmem>>, vector<8x1xf32>,
      %cst_26 = arith.constant 0.000000e+00 : f32
      %32 = vector.broadcast %cst_26 : f32 to vector<8x128xf32>
      %c0_27 = arith.constant 0 : index
      %c0_28 = arith.constant 0 : index
      %33 = vector.load %arg9[%c0_27, %c0_28] : memref<8x128xf32, #tpu.memory_space<vmem>>, vector<8x128xf32>
      tpu.vector_store %arg9[%c0_27, %c0_28], %32 {strides = array<i32>} : memref<8x128xf32, #tpu.memory_space<vmem>>, vector<8x128xf32>,
      %c0_29 = arith.constant 0 : index
      %c0_30 = arith.constant 0 : index
      %c0_31 = arith.constant 0 : index
      %34 = vector.load %arg3[%c0_29, %c0_30, %c0_31] : memref<1x8x32xf32, #tpu.memory_space<vmem>>, vector<1x8x32xf32>
      %35 = vector.shape_cast %34 : vector<1x8x32xf32> to vector<8x32xf32>
      %cst_32 = arith.constant 0.176776692 : f32
      %36 = vector.broadcast %cst_32 : f32 to vector<8x32xf32>
      %37 = arith.mulf %35, %36 : vector<8x32xf32>
      %c0_33 = arith.constant 0 : index
      %c0_34 = arith.constant 0 : index
      %38 = vector.load %arg10[%c0_33, %c0_34] : memref<8x32xf32, #tpu.memory_space<vmem>>, vector<8x32xf32>
      tpu.vector_store %arg10[%c0_33, %c0_34], %37 {strides = array<i32>} : memref<8x32xf32, #tpu.memory_space<vmem>>, vector<8x32xf32>,
    } else {
    }
    %c0 = arith.constant 0 : index
    %c0_1 = arith.constant 0 : index
    %3 = vector.load %arg10[%c0, %c0_1] : memref<8x32xf32, #tpu.memory_space<vmem>>, vector<8x32xf32>
    %c0_2 = arith.constant 0 : index
    %c0_3 = arith.constant 0 : index
    %c0_4 = arith.constant 0 : index
    %4 = vector.load %arg4[%c0_2, %c0_3, %c0_4] : memref<1x8x32xf32, #tpu.memory_space<vmem>>, vector<1x8x32xf32>
    %5 = vector.shape_cast %4 : vector<1x8x32xf32> to vector<8x32xf32>
    %cst = arith.constant dense<0.000000e+00> : vector<8x8xf32>
    %6 = tpu.matmul %3, %5, %cst {dimension_numbers = #tpu.dot_dimension_numbers<[1], [1], [0], [0], [0, 0, 1, 0], [], []>} : vector<8x32xf32>, vector<8x32xf32>, vector<8x8xf32> -> vector<8x8xf32>
    %c0_5 = arith.constant 0 : index
    %c0_6 = arith.constant 0 : index
    %7 = vector.load %arg7[%c0_5, %c0_6] : memref<8x1xf32, #tpu.memory_space<vmem>>, vector<8x1xf32>
    %cst_7 = arith.constant dense<0xFF800000> : vector<8xf32>
    %8 = vector.multi_reduction <maximumf>, %6, %cst_7 [1] : vector<8x8xf32> to vector<8xf32>
    %9 = vector.shape_cast %8 : vector<8xf32> to vector<8x1xf32>
    %10 = arith.maximumf %7, %9 : vector<8x1xf32>
    %11 = arith.subf %7, %10 : vector<8x1xf32>
    %12 = math.exp %11 : vector<8x1xf32>
    %13 = vector.broadcast %10 : vector<8x1xf32> to vector<8x8xf32>
    %14 = arith.subf %6, %13 : vector<8x8xf32>
    %15 = math.exp %14 : vector<8x8xf32>
    %c0_8 = arith.constant 0 : index
    %c0_9 = arith.constant 0 : index
    %16 = vector.load %arg9[%c0_8, %c0_9] : memref<8x128xf32, #tpu.memory_space<vmem>>, vector<8x128xf32>
    %17 = vector.broadcast %12 : vector<8x1xf32> to vector<8x128xf32>
    %18 = arith.mulf %17, %16 : vector<8x128xf32>
    %c0_10 = arith.constant 0 : index
    %c0_11 = arith.constant 0 : index
    %c0_12 = arith.constant 0 : index
    %19 = vector.load %arg5[%c0_10, %c0_11, %c0_12] : memref<1x8x128xf32, #tpu.memory_space<vmem>>, vector<1x8x128xf32>
    %20 = vector.shape_cast %19 : vector<1x8x128xf32> to vector<8x128xf32>
    %cst_13 = arith.constant dense<0.000000e+00> : vector<8x128xf32>
    %21 = tpu.matmul %15, %20, %cst_13 {dimension_numbers = #tpu.dot_dimension_numbers<[1], [0], [0], [1], [0, 0, 1, 1], [], []>} : vector<8x8xf32>, vector<8x128xf32>, vector<8x128xf32> -> vector<8x128xf32>
    %22 = arith.addf %18, %21 : vector<8x128xf32>
    %c0_14 = arith.constant 0 : index
    %c0_15 = arith.constant 0 : index
    %23 = vector.load %arg9[%c0_14, %c0_15] : memref<8x128xf32, #tpu.memory_space<vmem>>, vector<8x128xf32>
    tpu.vector_store %arg9[%c0_14, %c0_15], %22 {strides = array<i32>} : memref<8x128xf32, #tpu.memory_space<vmem>>, vector<8x128xf32>,
    %c0_16 = arith.constant 0 : index
    %c0_17 = arith.constant 0 : index
    %24 = vector.load %arg7[%c0_16, %c0_17] : memref<8x1xf32, #tpu.memory_space<vmem>>, vector<8x1xf32>
    tpu.vector_store %arg7[%c0_16, %c0_17], %10 {strides = array<i32>} : memref<8x1xf32, #tpu.memory_space<vmem>>, vector<8x1xf32>,
    %c0_i32_18 = arith.constant 0 : i32
    %25 = arith.cmpi eq, %arg2, %c0_i32_18 : i32
    %26 = arith.extui %25 : i1 to i32
    %c0_i32_19 = arith.constant 0 : i32
    %27 = arith.cmpi ne, %26, %c0_i32_19 : i32
    scf.if %27 {
      %c0_20 = arith.constant 0 : index
      %c0_21 = arith.constant 0 : index
      %28 = vector.load %arg9[%c0_20, %c0_21] : memref<8x128xf32, #tpu.memory_space<vmem>>, vector<8x128xf32>
      %29 = vector.extract_strided_slice %28 {offsets = [0, 32], sizes = [8, 1], strides = [1, 1]} : vector<8x128xf32> to vector<8x1xf32>
      %30 = tpu.reciprocal %29 {approx = true} : vector<8x1xf32> -> vector<8x1xf32>
      %31 = arith.mulf %29, %30 : vector<8x1xf32>
      %cst_22 = arith.constant 2.000000e+00 : f32
      %32 = vector.broadcast %cst_22 : f32 to vector<8x1xf32>
      %33 = arith.subf %32, %31 : vector<8x1xf32>
      %34 = arith.mulf %30, %33 : vector<8x1xf32>
      %35 = vector.broadcast %34 : vector<8x1xf32> to vector<8x128xf32>
      %36 = arith.mulf %28, %35 : vector<8x128xf32>
      %c0_23 = arith.constant 0 : index
      %c0_24 = arith.constant 0 : index
      %c0_25 = arith.constant 0 : index
      %37 = vector.load %arg6[%c0_23, %c0_24, %c0_25] : memref<1x8x128xf32, #tpu.memory_space<vmem>>, vector<1x8x128xf32>
      %38 = vector.shape_cast %37 : vector<1x8x128xf32> to vector<8x128xf32>
      %39 = vector.shape_cast %36 : vector<8x128xf32> to vector<1x8x128xf32>
      tpu.vector_store %arg6[%c0_23, %c0_24, %c0_25], %39 {strides = array<i32>} : memref<1x8x128xf32, #tpu.memory_space<vmem>>, vector<1x8x128xf32>,
    } else {
    }
    return
  }
  func.func @transform_0(%arg0: i32, %arg1: i32, %arg2: i32) -> (i32, i32, i32) {
    %c0_i32 = arith.constant 0 : i32
    %c0_i32_0 = arith.constant 0 : i32
    return %arg0, %arg1, %c0_i32 : i32, i32, i32
  }
  func.func @transform_1(%arg0: i32, %arg1: i32, %arg2: i32) -> (i32, i32, i32) {
    %c0_i32 = arith.constant 0 : i32
    %c0_i32_0 = arith.constant 0 : i32
    return %arg0, %arg2, %c0_i32 : i32, i32, i32
  }
  func.func @transform_2(%arg0: i32, %arg1: i32, %arg2: i32) -> (i32, i32, i32) {
    %c0_i32 = arith.constant 0 : i32
    %c0_i32_0 = arith.constant 0 : i32
    return %arg0, %arg2, %c0_i32 : i32, i32, i32
  }
  func.func @transform_3(%arg0: i32, %arg1: i32, %arg2: i32) -> (i32, i32, i32) {
    %c0_i32 = arith.constant 0 : i32
    %c0_i32_0 = arith.constant 0 : i32
    return %arg0, %arg1, %c0_i32 : i32, i32, i32
  }
}

</mosaic_0001>

<bundles_post_ra>
// kernel: tpu_custom_call.1
= control target key start
LH: loop header
LB: loop body
LE: loop exit
PB: predicated region body
PF: predicated region fallthrough
CT: control target
= control target key end

     0   :  { %s1236_s0 = inlined_call_operand.hbm [shape: f32[2,8,32], index: 0, kind: input, shape index: {}]   ;;  %s1237_s1 = inlined_call_operand.hbm [shape: f32[2,8,32], index: 1, kind: input, shape index: {}]   ;;  %s1238_s2 = inlined_call_operand.hbm [shape: f32[2,8,128], index: 2, kind: input, shape index: {}]   ;;  %s1239_s3 = inlined_call_operand.hbm [shape: f32[2,8,128], index: 3, kind: output, shape index: {}]  }
   0x1   :  { %1245 = sst [smem:[#allocation19_spill]] %s1237_s1 }
   0x2   :  { %8 = vsyncpa [#allocation7], 0 }
   0x3   :  { %10 = vsyncpa [#allocation7 + $0x1], 0 }
   0x4   :  { %11 = vsyncpa [#allocation10], 0 }
   0x5   :  { %13 = vsyncpa [#allocation10 + $0x1], 0 }
   0x6   :  { %14 = vsyncpa [#allocation8], 0 }
   0x7   :  { %16 = vsyncpa [#allocation8 + $0x1], 0  ;;  %s968_s12 = smov 0   ;;  %s970_s13 = smov 0  }
   0x8   :  { %s972_s14 = smov 0   ;;  %s974_s15 = smov 0  }
   0x9   :  { %s976_s16 = smov 0   ;;  %s978_s17 = smov 0  }
   0xa LB: > { %1246 = sst [smem:[#allocation16_spill]] %s933_s16  ;;  %s999_s18 = sadd.s32 4294967295, %s937_s17   ;;  %s937_s17 = sphi %s978_s17, %s22_s17   ;;  %s933_s16 = sphi %s976_s16, %s1267_s16   ;;  %s929_s15 = sphi %s974_s15, %s1266_s15   ;;  %s925_s14 = sphi %s972_s14, %s1270_s14   ;;  %s921_s13 = sphi %s970_s13, %s1269_s13   ;;  %s917_s12 = sphi %s968_s12, %s1268_s12  }
   0xb   : > { %s639_s19 = sadd.s32 4294967294, %s937_s17   ;;  %s41_s20 = sadd.s32 1, %s933_s16 }
   0xc   : > { %s50_s21 = sadd.s32 1, %s925_s14  ;;  %p43_p0 = scmp.ge.s32.totalorder %s41_s20, 2 }
   0xd   : > { %p57_p1 = scmp.ne.s32.totalorder %s925_s14, %s921_s13  ;;  %p58_p2 = scmp.eq.s32.totalorder %s937_s17, 0 }
   0xe   : > { %p63_p3 = scmp.ne.s32.totalorder %s921_s13, %s917_s12  ;;  %s1272_s20 = smov (%p43_p0, %s41_s20), 0 }
   0xf   : > { %1247 = sst [smem:[#allocation17_spill]] %s1272_s20  ;;  %p1011_p4 = por %p58_p2, %p57_p1 }
  0x10   : > { %p64_p5 = scmp.eq.s32.totalorder %s999_s18, 0  ;;  %s45_s23 = ssub.s32 %s933_s16, %s1272_s20 }
  0x11   : > { %p145_p6 = scmp.eq.s32.totalorder %s999_s18, 1  ;;  %p48_p7 = scmp.eq.s32.totalorder %s45_s23, 0 }
  0x12   : > { %p1019_p8 = por %p64_p5, %p63_p3  ;;  %p151_p10 = scmp.eq.s32.totalorder %s639_s19, 1 }
  0x13   : > { %p1023_p9 = por %p145_p6, %p57_p1  ;;  %p696_p13 = scmp.lt.s32.totalorder %s937_s17, 2 }
  0x14   : > { %s1249_s24 = scalar_select %p1019_p8, 1, 0 }
  0x15   : > { %s1250_s25 = scalar_select %p1023_p9, 1, 0 }
  0x16   : > { %s1028_s26 = scalar_select %p48_p7, %s925_s14, %s50_s21  }
  0x17   : > { %p1030_p11 = por %p151_p10, %p63_p3  ;;  %s171_s28 = sand.u32 1, %s925_s14  }
  0x18   : > { %1251 = sst [smem:[#allocation18_spill]] %s1028_s26  ;;  %s1039_s29 = sshll.u32 %s171_s28, 3 }
  0x19   : > { %s1252_s27 = scalar_select %p1030_p11, 1, 0 }
  0x1a   : > { %s1042_s30 = sshll.u32 %s933_s16, 7  ;;  %p1046_p0 = pnand %p696_p13, %p1011_p4 }
  0x1b   : > { %s190_s5 = sand.u32 1, %s937_s17   ;;  %s1254_s1 = sld [smem:[#allocation19_spill]] }
  0x1c   : > { %s1253_s4 = scalar_select %p1046_p0, 1, 0 }
  0x1d   : > { %s194_s9 = scalar_lea.vmem [#allocation9], %s1039_s29  ;;  %s1062_s11 = scalar_lea.sflag [#allocation10], %s190_s5 }
  0x1e   : > { %s202_s10 = sshll.u32 %s194_s9, 4  ;;  %p1068_p4 = pneg %p1046_p0  ;;  %s1059_s10 = int_to_ptr.vmem [resolvable:$true] %s202_s10 }
  0x21   : > { %s1055_s8 = scalar_lea.hbm %s1254_s1, %s1042_s30  ;;  %s766_s6 = scalar_lea.hbm %s1254_s1, 256 }
  0x22   : > { %s761_s19 = scalar_lea.hbm %s1055_s8, 128  ;;  %p767_p7 = scmp.lt.u32.totalorder %s1055_s8, %s1254_s1 }
  0x23   : > { %p762_p3 = scmp.ne.s32.totalorder %s1055_s8, %s761_s19  ;;  %p768_p10 = scmp.lt.u32.totalorder %s766_s6, %s761_s19 }
  0x24   : > { %p770_p12 = scmp.lt.u32.totalorder %s761_s19, %s1055_s8 }
  0x25   : > { %p764_p5 = pnand %p1068_p4, %p762_p3  ;;  %p769_p13 = por %p768_p10, %p767_p7 }
  0x27   : > { %p765_p6 = pneg %p764_p5  ;;  %p771_p1 = por %p770_p12, %p769_p13 }
  0x29   : > { %p772_p2 = pnand %p771_p1, %p765_p6 }
  0x2b   : > { %775 = shalt.err (!%p772_p2)
}
  0x2c   : > { %s776_s5 = scalar_lea.vmem %s1059_s10, 128  ;;  %s939_s22 = smov [#allocation9]  }
  0x2d   : > { %p777_p3 = scmp.ne.s32.totalorder %s1059_s10, %s776_s5  ;;  %s781_s23 = sshll.u32 %s939_s22, 4  ;;  %s782_s23 = int_to_ptr.vmem [resolvable:$false] %s781_s23 }
  0x2e   : > { %s783_s7 = scalar_lea.vmem %s782_s23, 256  ;;  %p784_p9 = scmp.lt.s32.totalorder %s1059_s10, %s782_s23 }
  0x2f   : > { %p779_p5 = pnand %p777_p3, %p1068_p4  ;;  %p785_p8 = scmp.lt.s32.totalorder %s783_s7, %s776_s5 }
  0x31   : > { %p780_p11 = pneg %p779_p5  ;;  %p786_p7 = por %p785_p8, %p784_p9 }
  0x33   : > { %p787_p10 = pnand %p786_p7, %p780_p11 }
  0x35   : > { %790 = shalt.err (!%p787_p10)
}
  0x36   : > { %688 = dma.hbm_to_vmem [thread:$0]  (!%p1046_p0), %s1055_s8, 128, %s1059_s10, %s1062_s11  }
  0x37   : > { %p1256_p12 = scmp.lt.s32.totalorder %s937_s17, 3  ;;  %p1257_p1 = scmp.ge.s32.totalorder %s937_s17, 1 }
  0x38   : > { %s1104_s5 = scalar_lea.hbm %s1236_s0, %s1042_s30  ;;  %s175_s22 = scalar_lea.vmem [#allocation6], %s1039_s29 }
  0x39   : > { %p1096_p2 = pnand %p1257_p1, %p1256_p12  ;;  %s183_s23 = sshll.u32 %s175_s22, 4  ;;  %s1107_s23 = int_to_ptr.vmem [resolvable:$true] %s183_s23 }
  0x3a   : > { %s1113_s7 = scalar_lea.hbm %s1238_s2, %s1042_s30  ;;  %s172_s1 = scalar_lea.sflag [#allocation7], %s171_s28 }
  0x3b   : > { %s1258_s19 = scalar_select %p1096_p2, 1, 0 }
  0x3c   : > { %s791_s20 = scalar_lea.hbm %s1104_s5, 128  ;;  %s796_s16 = scalar_lea.hbm %s1236_s0, 256 }
  0x3d   : > { %p792_p8 = scmp.ne.s32.totalorder %s1104_s5, %s791_s20  ;;  %p797_p6 = scmp.lt.u32.totalorder %s1104_s5, %s1236_s0 }
  0x3e   : > { %p798_p13 = scmp.lt.u32.totalorder %s796_s16, %s791_s20  ;;  %p800_p5 = scmp.lt.u32.totalorder %s791_s20, %s1104_s5 }
  0x3f   : > { %p794_p9 = pnand %p792_p8, %p1068_p4 }
  0x40   : > { %p799_p3 = por %p798_p13, %p797_p6 }
  0x41   : > { %p795_p11 = pneg %p794_p9 }
  0x42   : > { %p801_p7 = por %p800_p5, %p799_p3 }
  0x44   : > { %p802_p10 = pnand %p801_p7, %p795_p11 }
  0x46   : > { %805 = shalt.err (!%p802_p10)
}
  0x47   : > { %s806_s28 = scalar_lea.vmem %s1107_s23, 128  ;;  %s940_s30 = smov [#allocation6]  }
  0x48   : > { %p807_p12 = scmp.ne.s32.totalorder %s1107_s23, %s806_s28  ;;  %s811_s8 = sshll.u32 %s940_s30, 4  ;;  %s812_s8 = int_to_ptr.vmem [resolvable:$false] %s811_s8 }
  0x49   : > { %s813_s26 = scalar_lea.vmem %s812_s8, 256  ;;  %p814_p9 = scmp.lt.s32.totalorder %s1107_s23, %s812_s8 }
  0x4a   : > { %p809_p1 = pnand %p807_p12, %p1068_p4  ;;  %p815_p2 = scmp.lt.s32.totalorder %s813_s26, %s806_s28 }
  0x4c   : > { %p810_p8 = pneg %p809_p1  ;;  %p816_p6 = por %p815_p2, %p814_p9 }
  0x4e   : > { %p817_p13 = pnand %p816_p6, %p810_p8 }
  0x50   : > { %820 = shalt.err (!%p817_p13)
}
  0x51   : > { %685 = dma.hbm_to_vmem [thread:$0]  (!%p1046_p0), %s1104_s5, 128, %s1107_s23, %s172_s1  }
  0x52   : > { %s213_s16 = scalar_lea.vmem [#allocation11], %s1039_s29  ;;  %s821_s10 = scalar_lea.hbm %s1113_s7, 128 }
  0x53   : > { %s221_s20 = sshll.u32 %s213_s16, 4  ;;  %p822_p11 = scmp.ne.s32.totalorder %s1113_s7, %s821_s10  ;;  %s222_s20 = int_to_ptr.vmem [resolvable:$true] %s221_s20 }
  0x54   : > { %s826_s22 = scalar_lea.hbm %s1238_s2, 256  ;;  %p827_p5 = scmp.lt.u32.totalorder %s1113_s7, %s1238_s2 }
  0x55   : > { %p824_p2 = pnand %p822_p11, %p1068_p4  ;;  %p828_p7 = scmp.lt.u32.totalorder %s826_s22, %s821_s10 }
  0x56   : > { %p830_p12 = scmp.lt.u32.totalorder %s821_s10, %s1113_s7 }
  0x57   : > { %p825_p3 = pneg %p824_p2  ;;  %p829_p10 = por %p828_p7, %p827_p5 }
  0x59   : > { %p831_p1 = por %p830_p12, %p829_p10 }
  0x5b   : > { %p832_p8 = pnand %p831_p1, %p825_p3 }
  0x5d   : > { %835 = shalt.err (!%p832_p8)
}
  0x5e   : > { %s836_s1 = scalar_lea.vmem %s222_s20, 128  ;;  %s941_s29 = smov [#allocation11]  }
  0x5f   : > { %p837_p9 = scmp.ne.s32.totalorder %s222_s20, %s836_s1  ;;  %s841_s5 = sshll.u32 %s941_s29, 4  ;;  %s842_s5 = int_to_ptr.vmem [resolvable:$false] %s841_s5 }
  0x60   : > { %s843_s23 = scalar_lea.vmem %s842_s5, 256  ;;  %p844_p11 = scmp.lt.s32.totalorder %s222_s20, %s842_s5 }
  0x61   : > { %p839_p6 = pnand %p837_p9, %p1068_p4  ;;  %p845_p2 = scmp.lt.s32.totalorder %s843_s23, %s836_s1 }
  0x63   : > { %p840_p13 = pneg %p839_p6  ;;  %p846_p0 = por %p845_p2, %p844_p11 }
  0x65   : > { %p847_p5 = pnand %p846_p0, %p840_p13 }
  0x67   : > { %850 = shalt.err (!%p847_p5)
}
  0x68   : > { %p1259_p7 = scmp.ne.s32.totalorder %s1253_s4, 0  ;;  %p1260_p3 = scmp.ne.s32.totalorder %s1258_s19, 0 }
  0x69   : > { %s1160_s21 = sand.u32 (!%p1260_p3), 1, %s921_s13   ;;  %p1261_p0 = scmp.ne.s32.totalorder (!%p1260_p3), %s1249_s24, 0 }
  0x6a   : > { %691 = dma.hbm_to_vmem [thread:$0]  (!%p1259_p7), %s1113_s7, 128, %s222_s20, %s1062_s11  }
  0x6b   : > { %230 = sbr.rel (%p1260_p3) target bundleno = 1004 (0x3ec), region = 32  ;;  %s1163_s8 = sshll.u32 (!%p1260_p3), %s1160_s21, 3 }
  0x6c   : > { %s233_s26 = scalar_lea.sflag (!%p1260_p3), [#allocation7], %s1160_s21  ;;  %s236_s16 = scalar_lea.vmem (!%p1260_p3), [#allocation6], %s1163_s8 }
  0x72   : > { %904 = dma.done.wait (%p1261_p0), %s233_s26, 128  }
  0x73   : > { %906 = vsyncadd (%p1261_p0), %s233_s26, 4294967168  ;;  %s241_s4 = sand.u32 1, %s999_s18   ;;  %s245_s19 = scalar_lea.vmem [#allocation9], %s1163_s8 }
  0x74   : > { %s242_s11 = scalar_lea.sflag [#allocation10], %s241_s4 }
  0x75   : > { %908 = dma.done.wait (%p1261_p0), %s242_s11, 256  }
  0x76   : > { %910 = vsyncadd (%p1261_p0), %s242_s11, 4294967040  ;;  %vm291_vm0 = vcmask 7168   ;;  %v942_v0 = vmov 0.0   ;;  %vm943_vm1 = vmmov 0   ;;  %v295_v1 = vld [vmem:[%s236_s16] sm:$0xff]  ;;  %vm297_vm2 = vcmask 261120  }
  0x77   : > { %664 = vmatprep.subr.mxu0 %v942_v0  ;;  %666 = vmatprep.mubr.msk.f32.mxu0 %vm943_vm1, %v942_v0  ;;  %v300_v2 = vld [vmem:[%s245_s19] sm:$0xff]  ;;  %v296_v3 = vmul.f32 0.17677669, %v295_v1  ;;  %v944_v5 = vmov -inf   ;;  %vm379_vm3 = vcmask 64512   ;;  %v945_v9 = vmov 0  }
  0x78   : > { %669 = vmatprep.subr.mxu1 %v942_v0  ;;  %671 = vmatprep.mubr.msk.f32.mxu1 %vm943_vm1, %v942_v0  ;;  %292 = vst.msk [vmem:[#allocation2] sm:$0xff] %vm291_vm0, %v944_v5  ;;  %s254_s18 = scalar_lea.vmem [#allocation11], %s1163_s8  ;;  %v946_v21 = vmov 32   ;;  %s657_s24 = sshll.u32 %s929_s15, 7 }
  0x79   : > { %665 = vmatpush3.xpose.msk.msra.mxu0 %vm297_vm2, %v300_v2  ;;  %298 = vst.msk [vmem:[#allocation5] sm:$0xff] %vm297_vm2, %v296_v3  ;;  %751 = vset.pattern.permute.xlu0 %v945_v9  ;;  %v402_v15 = vld [vmem:[%s254_s18] sm:$0xff]  ;;  %s286_s7 = scalar_lea.vmem [#allocation12], %s1163_s8  ;;  %s1187_s9 = scalar_lea.hbm %s1239_s3, %s657_s24 }
  0x7a   : > { %752 = vset.pattern.permute.xlu1 %v945_v9  ;;  %670 = vmatpush3.msra.mxu1 %v402_v15  ;;  %s510_s20 = sshll.u32 %s286_s7, 4  ;;  %s496_s22 = scalar_lea.sflag [#allocation8], %s1160_s21  ;;  %s1189_s20 = int_to_ptr.vmem [resolvable:$true] %s510_s20 }
  0x7b   : > { %s851_s28 = scalar_lea.vmem %s1189_s20, 128  ;;  %p1262_p10 = scmp.ne.s32.totalorder %s1250_s25, 0 }
  0x7c   : > { %p852_p4 = scmp.ne.s32.totalorder %s1189_s20, %s851_s28  ;;  %s947_s15 = smov [#allocation12]  }
  0x7d   : > { %s855_s30 = sshll.u32 %s947_s15, 4  ;;  %s856_s30 = int_to_ptr.vmem [resolvable:$false] %s855_s30 }
  0x7e   : > { %p853_p12 = pnand %p852_p4, %p1262_p10  ;;  %s857_s1 = scalar_lea.vmem %s856_s30, 256 }
  0x7f   : > { %v378_v10 = vld [vmem:[#allocation2] sm:$0xff]  ;;  %p858_p8 = scmp.lt.s32.totalorder %s1189_s20, %s856_s30  ;;  %p859_p9 = scmp.lt.s32.totalorder %s857_s1, %s851_s28 }
  0x80   : > { %v299_v4 = vld [vmem:[#allocation5] sm:$0xff]  ;;  %p854_p1 = pneg %p853_p12 }
  0x81   : > { %667 = vmatmul.mubr.msk.f32.vlgmr.msra.gmra.mrb[0].mxu0 %vm297_vm2, %v299_v4  ;;  %p860_p6 = por %p859_p9, %p858_p8 }
  0x83   : > { %p861_p13 = pnand %p860_p6, %p854_p1 }
 0x154   : > { %v374_v6 = vpop.f32.mrb[0].mxu0 }
 0x155   : > { %v668_v7 = vpop.f32.mrb[1].mxu0  ;;  %v380_v8 = vsel %vm379_vm3, %v374_v6, -inf }
 0x156   : > { %381 = vmax.xlane.f32.xlu0 %v380_v8 }
 0x1e3   : > { %v382_v11 = vpop.xlane.xlu0 %381 }
 0x1e4   : > { %v383_v12 = vmax.f32 %v378_v10, %v382_v11 }
 0x1e6   : > { %v384_v13 = vsub.f32 %v378_v10, %v383_v12  ;;  %479 = vst.msk [vmem:[#allocation2] sm:$0xff] %vm291_vm0, %v383_v12  ;;  %389 = vperm.xlu0 %751, %v383_v12  }
 0x1e8   : > { %v385_v14 = vmul.f32 1.442695, %v384_v13 }
 0x1ea   : > { %755 = vpow2.f32 %v385_v14  ;;  %754 = vset.pattern.permute.xlu0 %v946_v21 }
 0x1f4   : > { %v756_v16 = vpop.eup %755 }
 0x1f5   : > { %398 = vperm.xlu1 %752, %v756_v16  }
 0x1f9   : > { %753 = vset.pattern.permute.xlu1 %v946_v21 }
 0x265   : > { %v390_v17 = vpop.permute.xlu0 %389 }
 0x266   : > { %v392_v18 = vsub.f32 %v374_v6, %v390_v17 }
 0x268   : > { %v393_v19 = vmul.f32 1.442695, %v392_v18 }
 0x26a   : > { %757 = vpow2.f32 %v393_v19 }
 0x274   : > { %v758_v20 = vpop.eup %757  ;;  %v399_v22 = vpop.permute.xlu1 %398 }
 0x275   : > { %672 = vmatmul.mubr.msk.f32.vlgmr.msra.gmra.mrb[0].mxu1 %vm379_vm3, %v758_v20  ;;  %v401_v23 = vmul.f32 0.0, %v399_v22 }
 0x348   : > { %v472_v24 = vpop.f32.mrb[0].mxu1 }
 0x349   : > { %v476_v25 = vadd.f32 %v472_v24, %v401_v23  ;;  %v673_v26 = vpop.f32.mrb[1].mxu1 }
 0x34b   : > { %759 = vrcp.f32 %v476_v25 }
 0x355   : > { %v760_v27 = vpop.eup %759 }
 0x356   : > { %v485_v28 = vmul.f32 %v760_v27, %v476_v25 }
 0x358   : > { %v486_v29 = vsub.f32 2.0, %v485_v28 }
 0x35a   : > { %v487_v30 = vmul.f32 %v760_v27, %v486_v29 }
 0x35c   : > { %490 = vperm.xlu1 %753, %v487_v30  }
 0x3db   : > { %v491_v31 = vpop.permute.xlu1 %490 }
 0x3dc   : > { %v493_v32 = vmul.f32 %v491_v31, %v476_v25 }
 0x3de   : > { %494 = vst [vmem:[%s286_s7] sm:$0xff] %v493_v32 }
 0x3df   : > { %864 = shalt.err (!%p861_p13)
}
 0x3e0   : > { %s865_s29 = scalar_lea.hbm %s1187_s9, 128  ;;  %s869_s21 = scalar_lea.hbm %s1239_s3, 256 }
 0x3e1   : > { %p866_p11 = scmp.ne.s32.totalorder %s1187_s9, %s865_s29  ;;  %p870_p7 = scmp.lt.u32.totalorder %s1187_s9, %s1239_s3 }
 0x3e2   : > { %p871_p3 = scmp.lt.u32.totalorder %s869_s21, %s865_s29  ;;  %p873_p4 = scmp.lt.u32.totalorder %s865_s29, %s1187_s9 }
 0x3e3   : > { %p867_p2 = pnand %p866_p11, %p1262_p10 }
 0x3e4   : > { %p872_p0 = por %p871_p3, %p870_p7 }
 0x3e5   : > { %p868_p5 = pneg %p867_p2 }
 0x3e6   : > { %p874_p12 = por %p873_p4, %p872_p0 }
 0x3e8   : > { %p875_p1 = pnand %p874_p12, %p868_p5 }
 0x3ea   : > { %878 = shalt.err (!%p875_p1)
}
 0x3eb   : > { %680 = dma.vmem_to_hbm [thread:$0]  (%p1262_p10), %s1189_s20, 128, %s1187_s9, %s496_s22  }
 0x3ec PF: > { %s522_s16 = sand.u32 1, %s917_s12   ;;  %p1263_p8 = scmp.ne.s32.totalorder %s1252_s27, 0 }
 0x3ed   : > { %p1264_p9 = scmp.ge.s32.totalorder %s937_s17, 2  ;;  %s523_s4 = scalar_lea.sflag [#allocation8], %s522_s16 }
 0x3ef   : > { %p693_p6 = pnand %p1264_p9, %p1263_p8 }
 0x3f1   : > { %912 = dma.done.wait (!%p693_p6), %s523_s4, 128  }
 0x3f2   : > { %914 = vsyncadd (!%p693_p6), %s523_s4, 4294967168  ;;  %s22_s17 = sadd.s32 1, %s937_s17   ;;  %s1265_s25 = sld [smem:[#allocation18_spill]] }
 0x3f3   : > { %p19_p13 = scmp.ge.s32.totalorder %s22_s17, 4   ;;  %s1266_s15 = sld [smem:[#allocation16_spill]] }
 0x3f4   : > { %s1267_s16 = sld [smem:[#allocation17_spill]]  ;;  %s1268_s12 = smov %s921_s13 }
 0x3f5   : > { %s1269_s13 = smov %s925_s14  ;;  %21 = sbr.rel (!%p19_p13) target bundleno = 10 (0xa), region = 109 }
 0x3f8   : > { %s1270_s14 = smov %s1265_s25 }
 0x3fc   :  { %528 = vsyncpa [#allocation7], 1 }
 0x3fd   :  { %530 = vsyncpa [#allocation7 + $0x1], 1 }
 0x3fe   :  { %531 = vsyncpa [#allocation10], 1 }
 0x3ff   :  { %533 = vsyncpa [#allocation10 + $0x1], 1 }
 0x400   :  { %534 = vsyncpa [#allocation8], 1 }
 0x401   :  { %536 = vsyncpa [#allocation8 + $0x1], 1 }

</bundles_post_ra>
